<compile_context>
chip_gen: v5e
topology: v5e:2x2
jax: 0.10.0
libtpu: 0.0.40
codegen_flags: <defaults>
</compile_context>

<pallas_src>
import functools

import jax
import jax.numpy as jnp
from jax.experimental import pallas as pl
from jax.experimental.pallas import tpu as pltpu


_LANE = 128
_DEFAULT_BLOCK_BUDGET = 24 << 20   # ~24 MiB of double-buffered blocks (v7x-safe)


def _block_bytes_per_lane(n_in, n_out, L, x_bytes, eps_bytes, out_bytes):
    """Double-buffered VMEM bytes per unit of time-tile width."""
    return 2 * (n_in * x_bytes               # x block
                + L * n_out * eps_bytes      # epsilon block
                + L * n_out * out_bytes      # samples block
                + 2 * n_out * out_bytes)     # mu + sigma blocks


def _pick_time_tile(T, B, per_lane_bytes, budget_bytes=_DEFAULT_BLOCK_BUDGET):
    """Largest 128-multiple divisor of T whose block footprint fits the budget.

    Falls back to TT = T when T has no 128-multiple divisor (small / ragged T).
    If B == 1 and T fits a single tile, split it so both v7x cores get work.
    """
    if T % _LANE == 0:
        tt = None
        for cand in range(T, 0, -_LANE):
            if T % cand == 0 and cand * per_lane_bytes <= budget_bytes:
                tt = cand
                break
        if tt is None:
            tt = _LANE
    else:
        # TODO(synk): for T % 128 != 0, flatten (n_out, T) -> a lane-dense
        # n_out*T slab in the wrapper to avoid masked vst partial stores.
        tt = T
    if B == 1 and tt == T and (T // 2) % _LANE == 0:
        tt = T // 2          # guarantee >= 2 parallel grid units for megacore
    return tt


def _vae_kernel(x_ref, w_ref, b_ref, eps_ref, samp_ref, mu_ref, sig_ref,
                *, n_out, L):
    """One grid step = one (batch, time-tile) and ALL L samples.

    x_ref    : (1, n_in, TT)        input tile (NCL, T on lanes)
    w_ref    : (2*n_out, n_in)      fused [W_mu; W_sigma]
    b_ref    : (2*n_out, 1)         fused bias
    eps_ref  : (L, 1, n_out, TT)    epsilon tiles for all L samples
    samp_ref : (L, 1, n_out, TT)    samples tiles
    mu_ref   : (1, n_out, TT)
    sig_ref  : (1, n_out, TT)
    """
    x = x_ref[0].astype(jnp.float32)             # (n_in, TT)
    w = w_ref[...].astype(jnp.float32)           # (2*n_out, n_in)
    bvec = b_ref[...].astype(jnp.float32)        # (2*n_out, 1)
    n_in = x.shape[0]

    if n_in <= 8:
        # Tiny contraction: unrolled broadcast-FMA on the VPU beats an almost
        # empty MXU push.  (n_in >~ 16 takes the MXU path below.)
        ms = bvec
        for k in range(n_in):
            ms = ms + w[:, k:k + 1] * x[k:k + 1, :]
    else:
        ms = jnp.dot(w, x, preferred_element_type=jnp.float32) + bvec

    mu = ms[:n_out, :]                            # (n_out, TT)
    sigma = ms[n_out:, :]                         # (n_out, TT)
    mu_ref[0] = mu.astype(mu_ref.dtype)
    sig_ref[0] = sigma.astype(sig_ref.dtype)

    # Reparameterization for all L samples of this tile (L is static & small).
    for l in range(L):
        eps = eps_ref[l, 0].astype(jnp.float32)
        samp_ref[l, 0] = (sigma * eps + mu).astype(samp_ref.dtype)


@functools.partial(jax.jit, static_argnames=("n_out", "L", "out_dtype"))
def vae_forward(x, weight, bias, epsilon, *, n_out, L, out_dtype=None):
    """x: (B, n_in, T) NCL (PyTorch Conv1d layout)
    weight: (2*n_out, n_in, 1)   Conv1d weight
    bias:   (2*n_out,)
    epsilon: (L*B, n_out, T)     pre-drawn N(0,1) noise, l-major (torch .repeat order)
    returns (samples (L*B, n_out, T), mu (B, n_out, T), sigma (B, n_out, T))
    """
    B, n_in, T = x.shape
    out_dtype = x.dtype if out_dtype is None else jnp.dtype(out_dtype)

    per_lane = _block_bytes_per_lane(
        n_in, n_out, L,
        x_bytes=jnp.dtype(x.dtype).itemsize,
        eps_bytes=jnp.dtype(epsilon.dtype).itemsize,
        out_bytes=jnp.dtype(out_dtype).itemsize)
    TT = _pick_time_tile(T, B, per_lane)
    num_tt = T // TT

    # Explicit VMEM limit derived from the same block estimate (+weights).
    footprint = TT * per_lane + 2 * 4 * (2 * n_out * (n_in + 1))
    vmem_limit = int(min(max(2 * footprint, 32 << 20), 64 << 20))

    w2d = weight[:, :, 0]                     # (2*n_out, n_in)  fused [W_mu; W_sigma]
    b2d = bias.reshape(2 * n_out, 1)          # (2*n_out, 1)
    eps4 = epsilon.reshape(L, B, n_out, T)    # free view of the l-major layout

    out_shapes = (
        jax.ShapeDtypeStruct((L, B, n_out, T), out_dtype),   # samples
        jax.ShapeDtypeStruct((B, n_out, T), out_dtype),      # mu
        jax.ShapeDtypeStruct((B, n_out, T), out_dtype),      # sigma
    )

    grid_spec = pltpu.PrefetchScalarGridSpec(
        num_scalar_prefetch=0,
        grid=(B, num_tt),
        in_specs=[
            pl.BlockSpec((1, n_in, TT), lambda b, t: (b, 0, t)),          # x
            pl.BlockSpec((2 * n_out, n_in), lambda b, t: (0, 0)),         # W (fused)
            pl.BlockSpec((2 * n_out, 1), lambda b, t: (0, 0)),            # bias (fused)
            pl.BlockSpec((L, 1, n_out, TT), lambda b, t: (0, b, 0, t)),   # eps
        ],
        out_specs=[
            pl.BlockSpec((L, 1, n_out, TT), lambda b, t: (0, b, 0, t)),   # samples
            pl.BlockSpec((1, n_out, TT), lambda b, t: (b, 0, t)),         # mu
            pl.BlockSpec((1, n_out, TT), lambda b, t: (b, 0, t)),         # sigma
        ],
    )

    samples4, mu, sigma = pl.pallas_call(
        functools.partial(_vae_kernel, n_out=n_out, L=L),
        out_shape=out_shapes,
        grid_spec=grid_spec,
        compiler_params=pltpu.CompilerParams(
            dimension_semantics=("parallel", "parallel"),
            vmem_limit_bytes=vmem_limit),
    )(x, w2d, b2d, eps4)

    samples = samples4.reshape(L * B, n_out, T)   # l-major, matches torch .repeat
    return samples, mu, sigma


if __name__ == "__main__":
    # Small shapes consistent with the module: Conv1d(n_in, 2*n_out, 1, bias=True)
    B, n_in, T = 2, 4, 16
    n_out = 32
    L = 2  # n_sam_per_datapoint

    key = jax.random.PRNGKey(0)
    kx, kw, kb, ke = jax.random.split(key, 4)

    x = jax.random.normal(kx, (B, n_in, T), dtype=jnp.float32)
    weight = jax.random.normal(kw, (2 * n_out, n_in, 1), dtype=jnp.float32) * 0.1
    bias = jax.random.normal(kb, (2 * n_out,), dtype=jnp.float32) * 0.1
    # Deterministic epsilon stands in for torch's in-module .normal_() draw;
    # ordering is l-major, matching torch's mu.repeat(L, 1, 1) pairing.
    # TODO(synk): optionally draw epsilon in-kernel via pltpu.prng_seed +
    # pltpu.prng_random_bits to drop the eps HBM read entirely.
    epsilon = jax.random.normal(ke, (L * B, n_out, T), dtype=jnp.float32)

    # ---- f32 path: exact check against a pure-JAX reference ----
    samples, mu, sigma = vae_forward(x, weight, bias, epsilon, n_out=n_out, L=L)
    jax.block_until_ready(samples)

    mu_sigma = jnp.einsum("oc,bct->bot", weight[:, :, 0], x) + bias[None, :, None]
    mu_r = mu_sigma[:, :n_out, :]
    sig_r = mu_sigma[:, n_out:, :]
    samples_r = jnp.tile(sig_r, (L, 1, 1)) * epsilon + jnp.tile(mu_r, (L, 1, 1))

    assert samples.shape == (L * B, n_out, T)
    assert jnp.allclose(samples, samples_r, atol=1e-4, rtol=1e-4)
    assert jnp.allclose(mu, mu_r, atol=1e-4, rtol=1e-4)
    assert jnp.allclose(sigma, sig_r, atol=1e-4, rtol=1e-4)

    # ---- bf16 epsilon/sample streams (halves the dominant HBM traffic) ----
    eps_bf16 = epsilon.astype(jnp.bfloat16)
    s_b, mu_b, sig_b = vae_forward(x, weight, bias, eps_bf16,
                                   n_out=n_out, L=L, out_dtype=jnp.bfloat16)
    jax.block_until_ready(s_b)
    samples_rb = (jnp.tile(sig_r, (L, 1, 1)) * eps_bf16.astype(jnp.float32)
                  + jnp.tile(mu_r, (L, 1, 1)))
    assert jnp.allclose(s_b.astype(jnp.float32), samples_rb, atol=3e-2, rtol=3e-2)

    print("KERNEL_OK")
</pallas_src>

<mosaic_0001>
module attributes {stable_mosaic.version = 11 : i64} {
  func.func @_vae_kernel(%arg0: i32, %arg1: i32, %arg2: memref<1x4x16xf32, #tpu.memory_space<vmem>>, %arg3: memref<64x4xf32, #tpu.memory_space<vmem>>, %arg4: memref<64x1xf32, #tpu.memory_space<vmem>>, %arg5: memref<2x1x32x16xf32, #tpu.memory_space<vmem>>, %arg6: memref<2x1x32x16xf32, #tpu.memory_space<vmem>>, %arg7: memref<1x32x16xf32, #tpu.memory_space<vmem>>, %arg8: memref<1x32x16xf32, #tpu.memory_space<vmem>>) attributes {dimension_semantics = [#tpu.dimension_semantics<parallel>, #tpu.dimension_semantics<parallel>], iteration_bounds = array<i64: 2, 1>, scalar_prefetch = 0 : i64, scratch_operands = 0 : i64, tpu.core_type = #tpu.core_type<tc>, window_params = [{transform_indices = @transform_0, window_bounds = array<i64: 1, 4, 16>}, {pipeline_mode = #tpu.pipeline_mode<synchronous>, transform_indices = @transform_1, window_bounds = array<i64: 64, 4>}, {pipeline_mode = #tpu.pipeline_mode<synchronous>, transform_indices = @transform_2, window_bounds = array<i64: 64, 1>}, {transform_indices = @transform_3, window_bounds = array<i64: 2, 1, 32, 16>}, {transform_indices = @transform_4, window_bounds = array<i64: 2, 1, 32, 16>}, {transform_indices = @transform_5, window_bounds = array<i64: 1, 32, 16>}, {transform_indices = @transform_6, window_bounds = array<i64: 1, 32, 16>}]} {
    %c0 = arith.constant 0 : index
    %c0_0 = arith.constant 0 : index
    %c0_1 = arith.constant 0 : index
    %0 = vector.load %arg2[%c0, %c0_0, %c0_1] : memref<1x4x16xf32, #tpu.memory_space<vmem>>, vector<1x4x16xf32>
    %1 = vector.shape_cast %0 : vector<1x4x16xf32> to vector<4x16xf32>
    %c0_2 = arith.constant 0 : index
    %c0_3 = arith.constant 0 : index
    %2 = vector.load %arg3[%c0_2, %c0_3] : memref<64x4xf32, #tpu.memory_space<vmem>>, vector<64x4xf32>
    %c0_4 = arith.constant 0 : index
    %c0_5 = arith.constant 0 : index
    %3 = vector.load %arg4[%c0_4, %c0_5] : memref<64x1xf32, #tpu.memory_space<vmem>>, vector<64x1xf32>
    %4 = vector.extract_strided_slice %2 {offsets = [0, 0], sizes = [64, 1], strides = [1, 1]} : vector<64x4xf32> to vector<64x1xf32>
    %5 = vector.extract_strided_slice %1 {offsets = [0, 0], sizes = [1, 16], strides = [1, 1]} : vector<4x16xf32> to vector<1x16xf32>
    %6 = vector.broadcast %4 : vector<64x1xf32> to vector<64x16xf32>
    %7 = vector.broadcast %5 : vector<1x16xf32> to vector<64x16xf32>
    %8 = arith.mulf %6, %7 : vector<64x16xf32>
    %9 = vector.broadcast %3 : vector<64x1xf32> to vector<64x16xf32>
    %10 = arith.addf %9, %8 : vector<64x16xf32>
    %11 = vector.extract_strided_slice %2 {offsets = [0, 1], sizes = [64, 1], strides = [1, 1]} : vector<64x4xf32> to vector<64x1xf32>
    %12 = vector.extract_strided_slice %1 {offsets = [1, 0], sizes = [1, 16], strides = [1, 1]} : vector<4x16xf32> to vector<1x16xf32>
    %13 = vector.broadcast %11 : vector<64x1xf32> to vector<64x16xf32>
    %14 = vector.broadcast %12 : vector<1x16xf32> to vector<64x16xf32>
    %15 = arith.mulf %13, %14 : vector<64x16xf32>
    %16 = arith.addf %10, %15 : vector<64x16xf32>
    %17 = vector.extract_strided_slice %2 {offsets = [0, 2], sizes = [64, 1], strides = [1, 1]} : vector<64x4xf32> to vector<64x1xf32>
    %18 = vector.extract_strided_slice %1 {offsets = [2, 0], sizes = [1, 16], strides = [1, 1]} : vector<4x16xf32> to vector<1x16xf32>
    %19 = vector.broadcast %17 : vector<64x1xf32> to vector<64x16xf32>
    %20 = vector.broadcast %18 : vector<1x16xf32> to vector<64x16xf32>
    %21 = arith.mulf %19, %20 : vector<64x16xf32>
    %22 = arith.addf %16, %21 : vector<64x16xf32>
    %23 = vector.extract_strided_slice %2 {offsets = [0, 3], sizes = [64, 1], strides = [1, 1]} : vector<64x4xf32> to vector<64x1xf32>
    %24 = vector.extract_strided_slice %1 {offsets = [3, 0], sizes = [1, 16], strides = [1, 1]} : vector<4x16xf32> to vector<1x16xf32>
    %25 = vector.broadcast %23 : vector<64x1xf32> to vector<64x16xf32>
    %26 = vector.broadcast %24 : vector<1x16xf32> to vector<64x16xf32>
    %27 = arith.mulf %25, %26 : vector<64x16xf32>
    %28 = arith.addf %22, %27 : vector<64x16xf32>
    %29 = vector.extract_strided_slice %28 {offsets = [0, 0], sizes = [32, 16], strides = [1, 1]} : vector<64x16xf32> to vector<32x16xf32>
    %30 = vector.extract_strided_slice %28 {offsets = [32, 0], sizes = [32, 16], strides = [1, 1]} : vector<64x16xf32> to vector<32x16xf32>
    %c0_6 = arith.constant 0 : index
    %c0_7 = arith.constant 0 : index
    %c0_8 = arith.constant 0 : index
    %31 = vector.load %arg7[%c0_6, %c0_7, %c0_8] : memref<1x32x16xf32, #tpu.memory_space<vmem>>, vector<1x32x16xf32>
    %32 = vector.shape_cast %31 : vector<1x32x16xf32> to vector<32x16xf32>
    %33 = vector.shape_cast %29 : vector<32x16xf32> to vector<1x32x16xf32>
    tpu.vector_store %arg7[%c0_6, %c0_7, %c0_8], %33 {strides = array<i32>} : memref<1x32x16xf32, #tpu.memory_space<vmem>>, vector<1x32x16xf32>,
    %c0_9 = arith.constant 0 : index
    %c0_10 = arith.constant 0 : index
    %c0_11 = arith.constant 0 : index
    %34 = vector.load %arg8[%c0_9, %c0_10, %c0_11] : memref<1x32x16xf32, #tpu.memory_space<vmem>>, vector<1x32x16xf32>
    %35 = vector.shape_cast %34 : vector<1x32x16xf32> to vector<32x16xf32>
    %36 = vector.shape_cast %30 : vector<32x16xf32> to vector<1x32x16xf32>
    tpu.vector_store %arg8[%c0_9, %c0_10, %c0_11], %36 {strides = array<i32>} : memref<1x32x16xf32, #tpu.memory_space<vmem>>, vector<1x32x16xf32>,
    %c0_12 = arith.constant 0 : index
    %c0_13 = arith.constant 0 : index
    %c0_14 = arith.constant 0 : index
    %c0_15 = arith.constant 0 : index
    %37 = vector.load %arg5[%c0_12, %c0_13, %c0_14, %c0_15] : memref<2x1x32x16xf32, #tpu.memory_space<vmem>>, vector<1x1x32x16xf32>
    %38 = vector.shape_cast %37 : vector<1x1x32x16xf32> to vector<32x16xf32>
    %39 = arith.mulf %30, %38 : vector<32x16xf32>
    %40 = arith.addf %39, %29 : vector<32x16xf32>
    %c0_16 = arith.constant 0 : index
    %c0_17 = arith.constant 0 : index
    %c0_18 = arith.constant 0 : index
    %c0_19 = arith.constant 0 : index
    %41 = vector.load %arg6[%c0_16, %c0_17, %c0_18, %c0_19] : memref<2x1x32x16xf32, #tpu.memory_space<vmem>>, vector<1x1x32x16xf32>
    %42 = vector.shape_cast %41 : vector<1x1x32x16xf32> to vector<32x16xf32>
    %43 = vector.shape_cast %40 : vector<32x16xf32> to vector<1x1x32x16xf32>
    tpu.vector_store %arg6[%c0_16, %c0_17, %c0_18, %c0_19], %43 {strides = array<i32>} : memref<2x1x32x16xf32, #tpu.memory_space<vmem>>, vector<1x1x32x16xf32>,
    %c1 = arith.constant 1 : index
    %c0_20 = arith.constant 0 : index
    %c0_21 = arith.constant 0 : index
    %c0_22 = arith.constant 0 : index
    %44 = vector.load %arg5[%c1, %c0_20, %c0_21, %c0_22] : memref<2x1x32x16xf32, #tpu.memory_space<vmem>>, vector<1x1x32x16xf32>
    %45 = vector.shape_cast %44 : vector<1x1x32x16xf32> to vector<32x16xf32>
    %46 = arith.mulf %30, %45 : vector<32x16xf32>
    %47 = arith.addf %46, %29 : vector<32x16xf32>
    %c1_23 = arith.constant 1 : index
    %c0_24 = arith.constant 0 : index
    %c0_25 = arith.constant 0 : index
    %c0_26 = arith.constant 0 : index
    %48 = vector.load %arg6[%c1_23, %c0_24, %c0_25, %c0_26] : memref<2x1x32x16xf32, #tpu.memory_space<vmem>>, vector<1x1x32x16xf32>
    %49 = vector.shape_cast %48 : vector<1x1x32x16xf32> to vector<32x16xf32>
    %50 = vector.shape_cast %47 : vector<32x16xf32> to vector<1x1x32x16xf32>
    tpu.vector_store %arg6[%c1_23, %c0_24, %c0_25, %c0_26], %50 {strides = array<i32>} : memref<2x1x32x16xf32, #tpu.memory_space<vmem>>, vector<1x1x32x16xf32>,
    return
  }
  func.func @transform_0(%arg0: i32, %arg1: i32) -> (i32, i32, i32) {
    %c0_i32 = arith.constant 0 : i32
    %c0_i32_0 = arith.constant 0 : i32
    return %arg0, %c0_i32, %arg1 : i32, i32, i32
  }
  func.func @transform_1(%arg0: i32, %arg1: i32) -> (i32, i32) {
    %c0_i32 = arith.constant 0 : i32
    %c0_i32_0 = arith.constant 0 : i32
    %c0_i32_1 = arith.constant 0 : i32
    return %c0_i32, %c0_i32_0 : i32, i32
  }
  func.func @transform_2(%arg0: i32, %arg1: i32) -> (i32, i32) {
    %c0_i32 = arith.constant 0 : i32
    %c0_i32_0 = arith.constant 0 : i32
    %c0_i32_1 = arith.constant 0 : i32
    return %c0_i32, %c0_i32_0 : i32, i32
  }
  func.func @transform_3(%arg0: i32, %arg1: i32) -> (i32, i32, i32, i32) {
    %c0_i32 = arith.constant 0 : i32
    %c0_i32_0 = arith.constant 0 : i32
    %c0_i32_1 = arith.constant 0 : i32
    return %c0_i32, %arg0, %c0_i32_0, %arg1 : i32, i32, i32, i32
  }
  func.func @transform_4(%arg0: i32, %arg1: i32) -> (i32, i32, i32, i32) {
    %c0_i32 = arith.constant 0 : i32
    %c0_i32_0 = arith.constant 0 : i32
    %c0_i32_1 = arith.constant 0 : i32
    return %c0_i32, %arg0, %c0_i32_0, %arg1 : i32, i32, i32, i32
  }
  func.func @transform_5(%arg0: i32, %arg1: i32) -> (i32, i32, i32) {
    %c0_i32 = arith.constant 0 : i32
    %c0_i32_0 = arith.constant 0 : i32
    return %arg0, %c0_i32, %arg1 : i32, i32, i32
  }
  func.func @transform_6(%arg0: i32, %arg1: i32) -> (i32, i32, i32) {
    %c0_i32 = arith.constant 0 : i32
    %c0_i32_0 = arith.constant 0 : i32
    return %arg0, %c0_i32, %arg1 : i32, i32, i32
  }
}

</mosaic_0001>

<bundles_post_ra>
// kernel: vae_forward.1
= control target key start
LH: loop header
LB: loop body
LE: loop exit
PB: predicated region body
PF: predicated region fallthrough
CT: control target
= control target key end

     0   :  { %s1117_s21 = smov 0   ;;  %s1119_s22 = smov 0   ;;  %s1404_s0 = inlined_call_operand.vmem [shape: f32[2,4,16], index: 0, kind: input, shape index: {}]   ;;  %s1405_s1 = inlined_call_operand.vmem [shape: f32[64,4], index: 1, kind: input, shape index: {}]   ;;  %s1406_s2 = inlined_call_operand.vmem [shape: f32[64,1], index: 2, kind: input, shape index: {}]   ;;  %s1407_s3 = inlined_call_operand.vmem [shape: f32[2,2,32,16], index: 3, kind: input, shape index: {}]   ;;  %s1408_s4 = inlined_call_operand.vmem [shape: f32[2,2,32,16], index: 4, kind: output, shape index: {0}]   ;;  %s1409_s5 = inlined_call_operand.vmem [shape: f32[2,32,16], index: 5, kind: output, shape index: {1}]   ;;  %s1410_s6 = inlined_call_operand.vmem [shape: f32[2,32,16], index: 6, kind: output, shape index: {2}]  }
   0x1   :  { %s1121_s23 = smov 0   ;;  %s1123_s24 = smov 0  }
   0x2   :  { %s1125_s25 = smov 0  }
   0x3 LB: > { %s29_s26 = sadd.s32 1, %s1072_s24  ;;  %s950_s27 = sadd.s32 4294967295, %s1076_s25   ;;  %s1076_s25 = sphi %s1125_s25, %s17_s25   ;;  %s1072_s24 = sphi %s1123_s24, %s1415_s24   ;;  %s1068_s23 = sphi %s1121_s23, %s1414_s23   ;;  %s1064_s22 = sphi %s1119_s22, %s1413_s22   ;;  %s1060_s21 = sphi %s1117_s21, %s1412_s21  }
   0x4   : > { %p31_p0 = scmp.ge.s32.totalorder %s29_s26, 2  ;;  %p115_p1 = scmp.ne.s32.totalorder %s1064_s22, %s1060_s21 }
   0x5   : > { %p116_p2 = scmp.eq.s32.totalorder %s1076_s25, 0  ;;  %p147_p4 = scmp.eq.s32.totalorder %s950_s27, 1 }
   0x6   : > { %s1417_s26 = smov (%p31_p0, %s29_s26), 0  ;;  %s108_s29 = sadd.s32 1, %s1064_s22 }
   0x7   : > { %p117_p3 = por %p116_p2, %p115_p1  ;;  %s103_s28 = ssub.s32 %s1072_s24, %s1417_s26 }
   0x8   : > { %p106_p5 = scmp.eq.s32.totalorder %s103_s28, 0  ;;  %p1152_p6 = por %p147_p4, %p115_p1 }
   0x9   : > { %p953_p7 = scmp.ge.s32.totalorder %s1076_s25, 2 }
   0xa   : > { %s1157_s7 = scalar_select %p106_p5, %s1064_s22, %s108_s29  }
   0xb   : > { %231 = sbr.rel (%p953_p7) target bundleno = 28 (0x1c), region = 24 }
  0x10   : > { %244 = sbr.rel (!%p117_p3) target bundleno = 28 (0x1c), region = 32  ;;  %s246_s8 = sand.u32 (%p117_p3), 1, %s1064_s22  }
  0x11   : > { %s978_s9 = sshll.u32 (%p117_p3), %s1072_s24, 5  ;;  %s954_s10 = sshll.u32 (%p117_p3), %s246_s8, 6 }
  0x12   : > { %s252_s13 = scalar_lea.vmem (%p117_p3), %s1407_s3, %s978_s9  ;;  %s248_s14 = scalar_lea.vmem (%p117_p3), [#allocation2], %s954_s10 }
  0x13   : > { %v295_v0 = vld [vmem:[%s252_s13] sm:$0xff] (%p117_p3)  ;;  %v297_v1 = vld [vmem:[%s252_s13 + $0x8] sm:$0xff] (%p117_p3)  ;;  %v299_v2 = vld [vmem:[%s252_s13 + $0x10] sm:$0xff] (%p117_p3) }
  0x14   : > { %296 = vst [vmem:[%s248_s14] sm:$0xff] (%p117_p3), %v295_v0  ;;  %v301_v3 = vld [vmem:[%s252_s13 + $0x18] sm:$0xff] (%p117_p3)  ;;  %v303_v4 = vld [vmem:[%s252_s13 + $0x40] sm:$0xff] (%p117_p3)  ;;  %v305_v5 = vld [vmem:[%s252_s13 + $0x48] sm:$0xff] (%p117_p3) }
  0x15   : > { %298 = vst [vmem:[%s248_s14 + $0x8] sm:$0xff] %v297_v1  ;;  %v307_v6 = vld [vmem:[%s252_s13 + $0x50] sm:$0xff]  ;;  %v309_v7 = vld [vmem:[%s252_s13 + $0x58] sm:$0xff] }
  0x16   : > { %300 = vst [vmem:[%s248_s14 + $0x10] sm:$0xff] %v299_v2 }
  0x17   : > { %302 = vst [vmem:[%s248_s14 + $0x18] sm:$0xff] %v301_v3 }
  0x18   : > { %304 = vst [vmem:[%s248_s14 + $0x20] sm:$0xff] %v303_v4 }
  0x19   : > { %306 = vst [vmem:[%s248_s14 + $0x28] sm:$0xff] %v305_v5 }
  0x1a   : > { %308 = vst [vmem:[%s248_s14 + $0x30] sm:$0xff] %v307_v6 }
  0x1b   : > { %310 = vst [vmem:[%s248_s14 + $0x38] sm:$0xff] %v309_v7 }
  0x1c PF: > { %p957_p8 = scmp.ge.s32.totalorder %s1076_s25, 1  ;;  %p315_p9 = scmp.lt.s32.totalorder %s1076_s25, 3 }
  0x1e   : > { %p316_p10 = pnand %p957_p8, %p315_p9 }
  0x1f   : > { %p373_p11 = scmp.lt.s32.totalorder (!%p316_p10), %s1068_s23, 1  ;;  %s322_s8 = sand.u32 (!%p316_p10), 1, %s1060_s21  }
  0x20   : > { %319 = sbr.rel (%p316_p10) target bundleno = 279 (0x117), region = 70  ;;  %s1304_s9 = sshll.u32 (!%p316_p10), %s322_s8, 6 }
  0x21   : > { %s1326_s12 = scalar_lea.vmem (!%p316_p10), [#allocation2], %s1304_s9  ;;  %s1344_s13 = scalar_lea.vmem (!%p316_p10), [#allocation3], %s1304_s9 }
  0x25   : > { %v1170_v8 = vld [vmem:[%s1405_s1 + $0x20] sm:$0xff]  ;;  %v1175_v9 = vld [vmem:[%s1405_s1 + $0x10] sm:$0xff]  ;;  %v1078_v11 = vmov 0   ;;  %v402_v12 = vld [vmem:[%s1405_s1 + $0x28] sm:$0xff]  ;;  %v1079_v25 = vmov 1   ;;  %v1080_v26 = vmov 2  }
  0x26   : > { %v1180_v10 = vld [vmem:[%s1405_s1] sm:$0xff]  ;;  %1028 = vset.pattern.permute.xlu2 %v1078_v11  ;;  %1027 = vset.pattern.permute.xlu1 %v1078_v11  ;;  %v400_v13 = vld [vmem:[%s1405_s1 + $0x18] sm:$0xff]  ;;  %v1194_v14 = vld [vmem:[%s1405_s1 + $0x8] sm:$0xff]  ;;  %v1081_v27 = vmov 3   ;;  %s1241_s15 = scalar_select %p373_p11, %s1068_s23, 1  ;;  %vm657_vm0 = vcmask 130048  }
  0x27   : > { %1026 = vset.pattern.permute.xlu0 %v1078_v11  ;;  %435 = vperm.xlu2 %1028, %v1170_v8   ;;  %v405_v15 = vld [vmem:[%s1406_s2] sm:$0xff]  ;;  %v404_v16 = vld [vmem:[%s1405_s1 + $0x38] sm:$0xff]  ;;  %v403_v17 = vld [vmem:[%s1405_s1 + $0x30] sm:$0xff]  ;;  %s981_s14 = sshll.u32 (%p1152_p6), %s1068_s23, 5 }
  0x28   : > { %425 = vperm.xlu1 %1027, %v1175_v9   ;;  %415 = vperm.xlu0 %1026, %v1180_v10   ;;  %v408_v18 = vld [vmem:[%s1406_s2 + $0x18] sm:$0xff]  ;;  %v407_v19 = vld [vmem:[%s1406_s2 + $0x10] sm:$0xff]  ;;  %v406_v20 = vld [vmem:[%s1406_s2 + $0x8] sm:$0xff]  ;;  %s960_s16 = sshll.u32 %s1241_s15, 2  ;;  %s979_s20 = sshll.u32 %s1241_s15, 5 }
  0x29   : > { %v411_v21 = vld [vmem:[%s1406_s2 + $0x30] sm:$0xff]  ;;  %v410_v22 = vld [vmem:[%s1406_s2 + $0x28] sm:$0xff]  ;;  %v409_v23 = vld [vmem:[%s1406_s2 + $0x20] sm:$0xff]  ;;  %s379_s19 = scalar_lea.vmem %s1404_s0, %s960_s16  ;;  %s1286_s29 = scalar_lea.vmem %s1410_s6, %s979_s20 }
  0x2a   : > { %v412_v24 = vld [vmem:[%s1406_s2 + $0x38] sm:$0xff]  ;;  %v396_v31 = vld [vmem:[%s379_s19] sm:$0xf]  ;;  %s1313_s11 = scalar_lea.vmem %s1409_s5, %s979_s20  ;;  %s726_s17 = scalar_lea.vmem (%p1152_p6), %s1408_s4, %s981_s14 }
  0x2b   : > { %v1249_v32 = vperm.slane %v396_v31, 0  ;;  %v1260_v48 = vperm.slane %v396_v31, 1  ;;  %v1274_v7 = vperm.slane %v396_v31, 2 }
  0x2f   : > { %440 = vperm.xlu2 %1028, %v402_v12  }
  0x30   : > { %430 = vperm.xlu1 %1027, %v400_v13   ;;  %420 = vperm.xlu0 %1026, %v1194_v14  }
  0x37   : > { %464 = vperm.xlu2 %1028, %v405_v15  }
  0x38   : > { %450 = vperm.xlu1 %1027, %v404_v16   ;;  %445 = vperm.xlu0 %1026, %v403_v17  }
  0x3f   : > { %479 = vperm.xlu2 %1028, %v408_v18  }
  0x40   : > { %474 = vperm.xlu1 %1027, %v407_v19   ;;  %469 = vperm.xlu0 %1026, %v406_v20  }
  0x47   : > { %494 = vperm.xlu2 %1028, %v411_v21  }
  0x48   : > { %489 = vperm.xlu1 %1027, %v410_v22   ;;  %484 = vperm.xlu0 %1026, %v409_v23  }
  0x4f   : > { %1030 = vset.pattern.permute.xlu2 %v1079_v25 }
  0x50   : > { %1029 = vset.pattern.permute.xlu1 %v1079_v25  ;;  %499 = vperm.xlu0 %1026, %v412_v24  }
  0x51   : > { %515 = vperm.xlu2 %1030, %v1194_v14   ;;  %511 = vperm.xlu1 %1029, %v1180_v10  }
  0x58   : > { %1031 = vset.pattern.permute.xlu0 %v1079_v25 }
  0x59   : > { %527 = vperm.xlu2 %1030, %v1170_v8   ;;  %523 = vperm.xlu1 %1029, %v400_v13  }
  0x5a   : > { %519 = vperm.xlu0 %1031, %v1175_v9  }
  0x61   : > { %535 = vperm.xlu2 %1030, %v403_v17   ;;  %531 = vperm.xlu1 %1029, %v402_v12  }
  0x62   : > { %539 = vperm.xlu0 %1031, %v404_v16  }
  0x69   : > { %1033 = vset.pattern.permute.xlu2 %v1080_v26  ;;  %1032 = vset.pattern.permute.xlu1 %v1080_v26 }
  0x6a   : > { %1034 = vset.pattern.permute.xlu0 %v1080_v26  ;;  %564 = vperm.xlu2 %1033, %v1194_v14  }
  0x6b   : > { %560 = vperm.xlu1 %1032, %v1180_v10   ;;  %568 = vperm.xlu0 %1034, %v1175_v9  }
  0x72   : > { %576 = vperm.xlu2 %1033, %v1170_v8  }
  0x73   : > { %572 = vperm.xlu1 %1032, %v400_v13   ;;  %588 = vperm.xlu0 %1034, %v404_v16  }
  0x7a   : > { %584 = vperm.xlu2 %1033, %v403_v17  }
  0x7b   : > { %580 = vperm.xlu1 %1032, %v402_v12   ;;  %1037 = vset.pattern.permute.xlu0 %v1081_v27 }
  0x7c   : > { %629 = vperm.xlu0 %1037, %v402_v12  }
  0x81   : > { %v436_v28 = vpop.permute.xlu2 %435 }
  0x82   : > { %1036 = vset.pattern.permute.xlu2 %v1081_v27  ;;  %v458_v4 = vmul.f32 %v1249_v32, %v436_v28 }
  0x83   : > { %1035 = vset.pattern.permute.xlu1 %v1081_v27  ;;  %625 = vperm.xlu2 %1036, %v1170_v8  }
  0x84   : > { %609 = vperm.xlu1 %1035, %v1180_v10   ;;  %621 = vperm.xlu0 %1037, %v400_v13  }
  0x89   : > { %v1238_v29 = vpop.permute.xlu2 %440 }
  0x8b   : > { %637 = vperm.xlu2 %1036, %v404_v16  }
  0x8c   : > { %633 = vperm.xlu1 %1035, %v403_v17  }
  0x91   : > { %v465_v30 = vpop.permute.xlu2 %464 }
  0x93   : > { %617 = vperm.xlu2 %1036, %v1175_v9   ;;  %v1277_v9 = vperm.slane %v396_v31, 3 }
  0x94   : > { %613 = vperm.xlu1 %1035, %v1194_v14  }
  0x99   : > { %v480_v33 = vpop.permute.xlu2 %479 }
  0x9a   : > { %v426_v34 = vpop.permute.xlu1 %425  ;;  %v416_v35 = vpop.permute.xlu0 %415 }
  0x9b   : > { %v454_v36 = vmul.f32 %v1249_v32, %v416_v35  ;;  %v456_v27 = vmul.f32 %v1249_v32, %v426_v34 }
  0x9d   : > { %v1252_v37 = vadd.f32 %v465_v30, %v454_v36  ;;  %v459_v30 = vmul.f32 %v1249_v32, %v1238_v29 }
  0xa1   : > { %v495_v38 = vpop.permute.xlu2 %494 }
  0xa2   : > { %v431_v39 = vpop.permute.xlu1 %430  ;;  %v421_v40 = vpop.permute.xlu0 %420 }
  0xa3   : > { %v457_v41 = vmul.f32 %v1249_v32, %v431_v39  ;;  %v455_v49 = vmul.f32 %v1249_v32, %v421_v40 }
  0xa5   : > { %v1255_v42 = vadd.f32 %v480_v33, %v457_v41 }
  0xaa   : > { %v451_v43 = vpop.permute.xlu1 %450  ;;  %v446_v44 = vpop.permute.xlu0 %445 }
  0xab   : > { %v460_v45 = vmul.f32 %v1249_v32, %v446_v44  ;;  %v516_v46 = vpop.permute.xlu2 %515  ;;  %v461_v17 = vmul.f32 %v1249_v32, %v451_v43 }
  0xac   : > { %v544_v50 = vmul.f32 %v1260_v48, %v516_v46 }
  0xad   : > { %v1258_v47 = vadd.f32 %v495_v38, %v460_v45 }
  0xb2   : > { %v475_v51 = vpop.permute.xlu1 %474  ;;  %v470_v52 = vpop.permute.xlu0 %469 }
  0xb3   : > { %v503_v53 = vadd.f32 %v470_v52, %v455_v49  ;;  %v528_v54 = vpop.permute.xlu2 %527  ;;  %v504_v35 = vadd.f32 %v475_v51, %v456_v27  ;;  %v667_v27 = vld [vmem:[%s1326_s12 + $0x8] sm:$0xff] }
  0xb4   : > { %v547_v5 = vmul.f32 %v1260_v48, %v528_v54 }
  0xb5   : > { %v1264_v55 = vadd.f32 %v544_v50, %v503_v53 }
  0xba   : > { %v490_v56 = vpop.permute.xlu1 %489  ;;  %v485_v57 = vpop.permute.xlu0 %484 }
  0xbb   : > { %v1266_v58 = vpop.permute.xlu2 %535  ;;  %v506_v6 = vadd.f32 %v485_v57, %v458_v4  ;;  %v507_v38 = vadd.f32 %v490_v56, %v459_v30  ;;  %v968_v4 = vld [vmem:[%s1326_s12 + $0x38] sm:$0xff] }
  0xbd   : > { %v555_v10 = vadd.f32 %v547_v5, %v506_v6  ;;  %v549_v5 = vmul.f32 %v1260_v48, %v1266_v58 }
  0xbf   : > { %v557_v58 = vadd.f32 %v549_v5, %v1258_v47  ;;  %v668_v47 = vld [vmem:[%s1326_s12 + $0x10] sm:$0xff] }
  0xc2   : > { %v500_v59 = vpop.permute.xlu0 %499 }
  0xc3   : > { %v512_v60 = vpop.permute.xlu1 %511  ;;  %v509_v19 = vadd.f32 %v500_v59, %v461_v17  ;;  %v666_v59 = vld [vmem:[%s1326_s12] sm:$0xff] }
  0xc4   : > { %v1268_v61 = vpop.permute.xlu2 %564  ;;  %v543_v49 = vmul.f32 %v1260_v48, %v512_v60  ;;  %v965_v60 = vld [vmem:[%s1326_s12 + $0x20] sm:$0xff] }
  0xc6   : > { %v551_v56 = vadd.f32 %v543_v49, %v1252_v37 }
  0xcb   : > { %v524_v62 = vpop.permute.xlu1 %523 }
  0xcc   : > { %v520_v63 = vpop.permute.xlu0 %519  ;;  %v577_v0 = vpop.permute.xlu2 %576  ;;  %v546_v50 = vmul.f32 %v1260_v48, %v524_v62  ;;  %v669_v62 = vld [vmem:[%s1326_s12 + $0x18] sm:$0xff] }
  0xcd   : > { %v596_v8 = vmul.f32 %v1274_v7, %v577_v0  ;;  %v545_v28 = vmul.f32 %v1260_v48, %v520_v63 }
  0xce   : > { %v554_v57 = vadd.f32 %v546_v50, %v1255_v42 }
  0xcf   : > { %v604_v14 = vadd.f32 %v596_v8, %v555_v10  ;;  %v553_v39 = vadd.f32 %v545_v28, %v504_v35  ;;  %v966_v28 = vld [vmem:[%s1326_s12 + $0x28] sm:$0xff] }
  0xd3   : > { %v532_v1 = vpop.permute.xlu1 %531 }
  0xd4   : > { %v540_v2 = vpop.permute.xlu0 %539  ;;  %v1270_v3 = vpop.permute.xlu2 %584  ;;  %v548_v31 = vmul.f32 %v1260_v48, %v532_v1 }
  0xd5   : > { %v550_v18 = vmul.f32 %v1260_v48, %v540_v2 }
  0xd6   : > { %v556_v41 = vadd.f32 %v548_v31, %v507_v38 }
  0xd7   : > { %v558_v22 = vadd.f32 %v550_v18, %v509_v19 }
  0xdd   : > { %v561_v11 = vpop.permute.xlu1 %560  ;;  %v569_v12 = vpop.permute.xlu0 %568 }
  0xde   : > { %v626_v13 = vpop.permute.xlu2 %625  ;;  %v594_v36 = vmul.f32 %v1274_v7, %v569_v12  ;;  %v592_v53 = vmul.f32 %v1274_v7, %v561_v11 }
  0xdf   : > { %v645_v15 = vmul.f32 %v1277_v9, %v626_v13 }
  0xe0   : > { %v602_v29 = vadd.f32 %v594_v36, %v553_v39  ;;  %v600_v1 = vadd.f32 %v592_v53, %v551_v56 }
  0xe1   : > { %v653_v16 = vadd.f32 %v645_v15, %v604_v14  ;;  %v598_v14 = vmul.f32 %v1274_v7, %v1270_v3 }
  0xe3   : > { %662 = vst.msk [vmem:[%s1286_s29] sm:$0xff] %vm657_vm0, %v653_v16  ;;  %v670_v6 = vmul.f32 %v666_v59, %v653_v16  ;;  %v687_v8 = vmul.f32 %v965_v60, %v653_v16  ;;  %v606_v16 = vadd.f32 %v598_v14, %v557_v58 }
  0xe5   : > { %v573_v20 = vpop.permute.xlu1 %572  ;;  %v589_v21 = vpop.permute.xlu0 %588 }
  0xe6   : > { %v599_v23 = vmul.f32 %v1274_v7, %v589_v21  ;;  %v638_v24 = vpop.permute.xlu2 %637  ;;  %v595_v54 = vmul.f32 %v1274_v7, %v573_v20  ;;  %v967_v20 = vld [vmem:[%s1326_s12 + $0x30] sm:$0xff] }
  0xe7   : > { %v648_v25 = vmul.f32 %v1277_v9, %v638_v24 }
  0xe8   : > { %v607_v26 = vadd.f32 %v599_v23, %v558_v22  ;;  %v603_v2 = vadd.f32 %v595_v54, %v554_v57  ;;  %v593_v22 = vmul.f32 %v1274_v7, %v1268_v61 }
  0xea   : > { %v656_v33 = vadd.f32 %v648_v25, %v607_v26  ;;  %v601_v31 = vadd.f32 %v593_v22, %v1264_v55 }
  0xec   : > { %665 = vst.msk [vmem:[%s1286_s29 + $0x18] sm:$0xff] %vm657_vm0, %v656_v33  ;;  %v673_v10 = vmul.f32 %v669_v62, %v656_v33  ;;  %v690_v13 = vmul.f32 %v968_v4, %v656_v33 }
  0xed   : > { %v581_v40 = vpop.permute.xlu1 %580 }
  0xee   : > { %v597_v34 = vmul.f32 %v1274_v7, %v581_v40  ;;  %v618_v43 = vpop.permute.xlu2 %617  ;;  %v630_v44 = vpop.permute.xlu0 %629 }
  0xef   : > { %v643_v32 = vmul.f32 %v1277_v9, %v618_v43  ;;  %v646_v45 = vmul.f32 %v1277_v9, %v630_v44 }
  0xf0   : > { %v605_v46 = vadd.f32 %v597_v34, %v556_v41 }
  0xf1   : > { %v651_v51 = vadd.f32 %v643_v32, %v602_v29 }
  0xf2   : > { %v654_v52 = vadd.f32 %v646_v45, %v605_v46 }
  0xf3   : > { %660 = vst.msk [vmem:[%s1313_s11 + $0x10] sm:$0xff] %vm657_vm0, %v651_v51 }
  0xf4   : > { %663 = vst.msk [vmem:[%s1286_s29 + $0x8] sm:$0xff] %vm657_vm0, %v654_v52  ;;  %v671_v61 = vmul.f32 %v667_v27, %v654_v52  ;;  %v688_v7 = vmul.f32 %v966_v28, %v654_v52 }
  0xf6   : > { %v610_v63 = vpop.permute.xlu1 %609  ;;  %v622_v0 = vpop.permute.xlu0 %621 }
  0xf7   : > { %v641_v37 = vmul.f32 %v1277_v9, %v610_v63  ;;  %v644_v42 = vmul.f32 %v1277_v9, %v622_v0 }
  0xf9   : > { %v649_v11 = vadd.f32 %v641_v37, %v600_v1  ;;  %v652_v12 = vadd.f32 %v644_v42, %v603_v2 }
  0xfb   : > { %658 = vst.msk [vmem:[%s1313_s11] sm:$0xff] %vm657_vm0, %v649_v11  ;;  %v674_v15 = vadd.f32 %v670_v6, %v649_v11  ;;  %v691_v17 = vadd.f32 %v687_v8, %v649_v11  ;;  %v677_v18 = vadd.f32 %v673_v10, %v652_v12  ;;  %v694_v48 = vadd.f32 %v690_v13, %v652_v12 }
  0xfc   : > { %661 = vst.msk [vmem:[%s1313_s11 + $0x18] sm:$0xff] %vm657_vm0, %v652_v12 }
  0xfd   : > { %678 = vst.msk [vmem:[%s1344_s13] sm:$0xff] %vm657_vm0, %v674_v15 }
  0xfe   : > { %969 = vst.msk [vmem:[%s1344_s13 + $0x20] sm:$0xff] %vm657_vm0, %v691_v17  ;;  %v634_v3 = vpop.permute.xlu1 %633 }
  0xff   : > { %681 = vst.msk [vmem:[%s1344_s13 + $0x18] sm:$0xff] %vm657_vm0, %v677_v18  ;;  %v647_v19 = vmul.f32 %v1277_v9, %v634_v3 }
 0x100   : > { %972 = vst.msk [vmem:[%s1344_s13 + $0x38] sm:$0xff] %vm657_vm0, %v694_v48 }
 0x101   : > { %v655_v21 = vadd.f32 %v647_v19, %v606_v16 }
 0x103   : > { %664 = vst.msk [vmem:[%s1286_s29 + $0x10] sm:$0xff] %vm657_vm0, %v655_v21  ;;  %v672_v23 = vmul.f32 %v668_v47, %v655_v21  ;;  %v689_v24 = vmul.f32 %v967_v20, %v655_v21 }
 0x104   : > { %v769_v55 = vld [vmem:[%s1344_s13] sm:$0xff] (%p1152_p6) }
 0x105   : > { %v676_v25 = vadd.f32 %v672_v23, %v651_v51  ;;  %v693_v26 = vadd.f32 %v689_v24, %v651_v51  ;;  %770 = vst [vmem:[%s726_s17] sm:$0xff] (%p1152_p6), %v769_v55  ;;  %v777_v41 = vld [vmem:[%s1344_s13 + $0x20] sm:$0xff] (%p1152_p6) }
 0x106   : > { %v614_v30 = vpop.permute.xlu1 %613  ;;  %v775_v40 = vld [vmem:[%s1344_s13 + $0x18] sm:$0xff] (%p1152_p6)  ;;  %778 = vst [vmem:[%s726_s17 + $0x40] sm:$0xff] (%p1152_p6), %v777_v41 }
 0x107   : > { %680 = vst.msk [vmem:[%s1344_s13 + $0x10] sm:$0xff] %vm657_vm0, %v676_v25  ;;  %v642_v33 = vmul.f32 %v1277_v9, %v614_v30  ;;  %v783_v44 = vld [vmem:[%s1344_s13 + $0x38] sm:$0xff] (%p1152_p6) }
 0x108   : > { %971 = vst.msk [vmem:[%s1344_s13 + $0x30] sm:$0xff] %vm657_vm0, %v693_v26 }
 0x109   : > { %v650_v35 = vadd.f32 %v642_v33, %v601_v31  ;;  %776 = vst [vmem:[%s726_s17 + $0x18] sm:$0xff] (%p1152_p6), %v775_v40 }
 0x10a   : > { %722 = sbr.rel (!%p1152_p6) target bundleno = 279 (0x117), region = 78  ;;  %784 = vst [vmem:[%s726_s17 + $0x58] sm:$0xff] (%p1152_p6), %v783_v44 }
 0x10b   : > { %659 = vst.msk [vmem:[%s1313_s11 + $0x8] sm:$0xff] %vm657_vm0, %v650_v35  ;;  %v675_v36 = vadd.f32 %v671_v61, %v650_v35  ;;  %v692_v38 = vadd.f32 %v688_v7, %v650_v35 }
 0x10d   : > { %679 = vst.msk [vmem:[%s1344_s13 + $0x8] sm:$0xff] %vm657_vm0, %v675_v36 }
 0x10e   : > { %970 = vst.msk [vmem:[%s1344_s13 + $0x28] sm:$0xff] %vm657_vm0, %v692_v38  ;;  %v773_v39 = vld [vmem:[%s1344_s13 + $0x10] sm:$0xff] (%p1152_p6) }
 0x10f   : > { %774 = vst [vmem:[%s726_s17 + $0x10] sm:$0xff] %v773_v39  ;;  %v781_v43 = vld [vmem:[%s1344_s13 + $0x30] sm:$0xff] }
 0x110   : > { %782 = vst [vmem:[%s726_s17 + $0x50] sm:$0xff] %v781_v43 }
 0x114   : > { %v771_v9 = vld [vmem:[%s1344_s13 + $0x8] sm:$0xff] }
 0x115   : > { %772 = vst [vmem:[%s726_s17 + $0x8] sm:$0xff] %v771_v9  ;;  %v779_v34 = vld [vmem:[%s1344_s13 + $0x28] sm:$0xff] }
 0x116   : > { %780 = vst [vmem:[%s726_s17 + $0x48] sm:$0xff] %v779_v34 }
 0x117 PF: > { %s17_s25 = sadd.s32 1, %s1076_s25   ;;  %s1412_s21 = smov %s1064_s22 }
 0x118   : > { %p14_p12 = scmp.ge.s32.totalorder %s17_s25, 4   ;;  %s1413_s22 = smov %s1157_s7 }
 0x119   : > { %s1414_s23 = smov %s1072_s24  ;;  %s1415_s24 = smov %s1417_s26 }
 0x11a   :  { %16 = sbr.rel (!%p14_p12) target bundleno = 3 (0x3), region = 176 }

</bundles_post_ra>
